<compile_context>
chip_gen: v6e
topology: v6e:2x2x1
jax: 0.10.0
libtpu: 0.0.40
codegen_flags: <defaults>
</compile_context>

<pallas_src>
import jax
import jax.numpy as jnp
from jax.experimental import pallas as pl
from jax.experimental.pallas import tpu as pltpu


def _round_up(v, m):
    return ((v + m - 1) // m) * m


def _patch_embed_kernel(x_ref, w_ref, b_ref, o_ref, acc_ref):
    # x_ref:   (1, TP, ps)  f32 patch rows for (batch b, channel c), P-tile pt
    # w_ref:   (1, ps, E)   f32 conv-weight slab for channel c (resident per c)
    # b_ref:   (1, E)       f32 bias (resident)
    # o_ref:   (1, TP, E)   output tile, resident across the channel (reduction) axis
    # acc_ref: (TP, E)      f32 accumulator scratch
    c = pl.program_id(2)

    @pl.when(c == 0)
    def _():
        acc_ref[...] = jnp.zeros_like(acc_ref)

    acc_ref[...] += jnp.dot(x_ref[0], w_ref[0], preferred_element_type=jnp.float32)

    @pl.when(c == pl.num_programs(2) - 1)
    def _():
        o_ref[0] = (acc_ref[...] + b_ref[...]).astype(o_ref.dtype)


def patch_embedding(x, weight, bias, patch_size, *, tp=1024, min_pallas_rows=64):
    """
    x:      (B, C_in, L)  float32, L % patch_size == 0   (PyTorch NCL layout)
    weight: (E, C_in, patch_size)                        (PyTorch Conv1d weight layout)
    bias:   (E,)
    returns (B, L // patch_size, E)  -- matches PyTorch forward's permute(0, 2, 1)
    """
    B, C, L = x.shape
    E = weight.shape[0]
    assert L % patch_size == 0, "Input length must be divisible by patch size"
    ps = patch_size
    P = L // ps

    # Small-problem bypass: pallas_call launch overhead dominates; let XLA fuse one GEMM.
    if B * P < min_pallas_rows:
        xp = x.reshape(B, C, P, ps).transpose(0, 2, 1, 3).reshape(B, P, C * ps)
        return (xp @ weight.reshape(E, C * ps).T + bias[None, None, :]).astype(x.dtype)

    # (B, C, L) -> (B*C, P, ps): pure reshape, no HBM transpose pass for any C.
    x3 = x.reshape(B * C, P, ps)
    # (E, C, ps) -> (C, ps, E): tiny one-off transpose of the (small) weights.
    w3 = jnp.transpose(weight, (1, 2, 0)).astype(jnp.float32)
    b2 = bias.reshape(1, E).astype(jnp.float32)

    # Patch-row tile along P: multiple of 8 (or == P when P < 8), capped at `tp`.
    # Ragged / oversized last tile is masked by Pallas (garbage rows never written back).
    if P <= 8:
        TP = P
    else:
        TP = min(_round_up(P, 8), _round_up(tp, 8))

    grid = (B, pl.cdiv(P, TP), C)  # reduction (channel) axis last, innermost

    out = pl.pallas_call(
        _patch_embed_kernel,
        out_shape=jax.ShapeDtypeStruct((B, P, E), x.dtype),
        grid_spec=pltpu.PrefetchScalarGridSpec(
            num_scalar_prefetch=0,
            grid=grid,
            in_specs=[
                # patches for (batch b, channel c): row b*C + c of x3
                pl.BlockSpec((1, TP, ps), lambda b, pt, c: (b * C + c, pt, 0)),
                # per-channel weight slab: resident for the whole (b, pt) sweep
                pl.BlockSpec((1, ps, E), lambda b, pt, c: (c, 0, 0)),
                # bias: resident
                pl.BlockSpec((1, E), lambda b, pt, c: (0, 0)),
            ],
            # constant over c -> output tile stays resident across the reduction axis
            out_specs=pl.BlockSpec((1, TP, E), lambda b, pt, c: (b, pt, 0)),
            scratch_shapes=[pltpu.VMEM((TP, E), jnp.float32)],
        ),
        compiler_params=pltpu.CompilerParams(
            dimension_semantics=("parallel", "parallel", "arbitrary"),
            vmem_limit_bytes=32 * 1024 * 1024,  # safe on v5e/v6e/v7x; tiles are tiny
        ),
    )(x3, w3, b2)
    return out


def _reference(x, weight, bias, patch_size):
    # Pure-JAX f32 reference of the PyTorch forward (Conv1d stride=kernel + permute).
    B, C, L = x.shape
    E = weight.shape[0]
    P = L // patch_size
    xp = x.reshape(B, C, P, patch_size).transpose(0, 2, 1, 3).reshape(B, P, C * patch_size)
    return xp @ weight.reshape(E, -1).T + bias[None, None, :]


if __name__ == "__main__":
    key = jax.random.PRNGKey(0)

    # --- Test 1: module defaults (C=1, ps=20, E=20), tiny -> XLA bypass path --------------
    kx, kw, kb, key = jax.random.split(key, 4)
    x1 = jax.random.normal(kx, (2, 1, 160), dtype=jnp.float32)                  # P=8, M=16
    w1 = jax.random.normal(kw, (20, 1, 20), dtype=jnp.float32) * 0.05
    b1 = jax.random.normal(kb, (20,), dtype=jnp.float32) * 0.05
    out1 = jax.block_until_ready(patch_embedding(x1, w1, b1, 20))
    ref1 = _reference(x1, w1, b1, 20)
    assert out1.shape == (2, 8, 20), out1.shape
    assert jnp.allclose(out1, ref1, atol=1e-2, rtol=1e-2), "mismatch vs reference (test 1)"

    # --- Test 2: C_in > 1, fused channel reduction in the Pallas kernel -------------------
    kx, kw, kb, key = jax.random.split(key, 4)
    x2 = jax.random.normal(kx, (4, 2, 2000), dtype=jnp.float32)                 # P=100
    w2 = jax.random.normal(kw, (20, 2, 20), dtype=jnp.float32) * 0.05
    b2 = jax.random.normal(kb, (20,), dtype=jnp.float32) * 0.05
    out2 = jax.block_until_ready(patch_embedding(x2, w2, b2, 20))
    ref2 = _reference(x2, w2, b2, 20)
    assert out2.shape == (4, 100, 20), out2.shape
    assert jnp.allclose(out2, ref2, atol=1e-2, rtol=1e-2), "mismatch vs reference (test 2)"

    # --- Test 3: C=1 through the Pallas path (multi-batch grid, ragged-free tile) ---------
    kx, kw, kb, key = jax.random.split(key, 4)
    x3 = jax.random.normal(kx, (8, 1, 1600), dtype=jnp.float32)                 # P=80
    w3 = jax.random.normal(kw, (20, 1, 20), dtype=jnp.float32) * 0.05
    b3 = jax.random.normal(kb, (20,), dtype=jnp.float32) * 0.05
    out3 = jax.block_until_ready(patch_embedding(x3, w3, b3, 20))
    ref3 = _reference(x3, w3, b3, 20)
    assert out3.shape == (8, 80, 20), out3.shape
    assert jnp.allclose(out3, ref3, atol=1e-2, rtol=1e-2), "mismatch vs reference (test 3)"

    print("KERNEL_OK")
</pallas_src>

<mosaic_0001>
module attributes {stable_mosaic.version = 11 : i64} {
  func.func @_patch_embed_kernel(%arg0: i32, %arg1: i32, %arg2: i32, %arg3: memref<1x104x20xf32, #tpu.memory_space<vmem>>, %arg4: memref<1x20x20xf32, #tpu.memory_space<vmem>>, %arg5: memref<1x20xf32, #tpu.memory_space<vmem>>, %arg6: memref<1x104x20xf32, #tpu.memory_space<vmem>>, %arg7: memref<104x20xf32, #tpu.memory_space<vmem>>) attributes {dimension_semantics = [#tpu.dimension_semantics<parallel>, #tpu.dimension_semantics<parallel>, #tpu.dimension_semantics<arbitrary>], iteration_bounds = array<i64: 4, 1, 2>, scalar_prefetch = 0 : i64, scratch_operands = 1 : i64, tpu.core_type = #tpu.core_type<tc>, window_params = [{transform_indices = @transform_0, window_bounds = array<i64: 1, 104, 20>}, {transform_indices = @transform_1, window_bounds = array<i64: 1, 20, 20>}, {pipeline_mode = #tpu.pipeline_mode<synchronous>, transform_indices = @transform_2, window_bounds = array<i64: 1, 20>}, {transform_indices = @transform_3, window_bounds = array<i64: 1, 104, 20>}]} {
    %c0_i32 = arith.constant 0 : i32
    %0 = arith.cmpi eq, %arg2, %c0_i32 : i32
    %1 = arith.extui %0 : i1 to i32
    %c0_i32_0 = arith.constant 0 : i32
    %2 = arith.cmpi ne, %1, %c0_i32_0 : i32
    scf.if %2 {
      %cst_11 = arith.constant 0.000000e+00 : f32
      %14 = vector.broadcast %cst_11 : f32 to vector<104x20xf32>
      %c0_12 = arith.constant 0 : index
      %c0_13 = arith.constant 0 : index
      %15 = vector.load %arg7[%c0_12, %c0_13] : memref<104x20xf32, #tpu.memory_space<vmem>>, vector<104x20xf32>
      tpu.vector_store %arg7[%c0_12, %c0_13], %14 {strides = array<i32>} : memref<104x20xf32, #tpu.memory_space<vmem>>, vector<104x20xf32>,
    } else {
    }
    %c0 = arith.constant 0 : index
    %c0_1 = arith.constant 0 : index
    %3 = vector.load %arg7[%c0, %c0_1] : memref<104x20xf32, #tpu.memory_space<vmem>>, vector<104x20xf32>
    %c0_2 = arith.constant 0 : index
    %c0_3 = arith.constant 0 : index
    %c0_4 = arith.constant 0 : index
    %4 = vector.load %arg3[%c0_2, %c0_3, %c0_4] : memref<1x104x20xf32, #tpu.memory_space<vmem>>, vector<1x104x20xf32>
    %5 = vector.shape_cast %4 : vector<1x104x20xf32> to vector<104x20xf32>
    %c0_5 = arith.constant 0 : index
    %c0_6 = arith.constant 0 : index
    %c0_7 = arith.constant 0 : index
    %6 = vector.load %arg4[%c0_5, %c0_6, %c0_7] : memref<1x20x20xf32, #tpu.memory_space<vmem>>, vector<1x20x20xf32>
    %7 = vector.shape_cast %6 : vector<1x20x20xf32> to vector<20x20xf32>
    %cst = arith.constant dense<0.000000e+00> : vector<104x20xf32>
    %8 = tpu.matmul %5, %7, %cst {dimension_numbers = #tpu.dot_dimension_numbers<[1], [0], [0], [1], [0, 0, 1, 1], [], []>} : vector<104x20xf32>, vector<20x20xf32>, vector<104x20xf32> -> vector<104x20xf32>
    %9 = arith.addf %3, %8 : vector<104x20xf32>
    %c0_8 = arith.constant 0 : index
    %c0_9 = arith.constant 0 : index
    %10 = vector.load %arg7[%c0_8, %c0_9] : memref<104x20xf32, #tpu.memory_space<vmem>>, vector<104x20xf32>
    tpu.vector_store %arg7[%c0_8, %c0_9], %9 {strides = array<i32>} : memref<104x20xf32, #tpu.memory_space<vmem>>, vector<104x20xf32>,
    %c1_i32 = arith.constant 1 : i32
    %11 = arith.cmpi eq, %arg2, %c1_i32 : i32
    %12 = arith.extui %11 : i1 to i32
    %c0_i32_10 = arith.constant 0 : i32
    %13 = arith.cmpi ne, %12, %c0_i32_10 : i32
    scf.if %13 {
      %c0_11 = arith.constant 0 : index
      %c0_12 = arith.constant 0 : index
      %14 = vector.load %arg7[%c0_11, %c0_12] : memref<104x20xf32, #tpu.memory_space<vmem>>, vector<104x20xf32>
      %c0_13 = arith.constant 0 : index
      %c0_14 = arith.constant 0 : index
      %15 = vector.load %arg5[%c0_13, %c0_14] : memref<1x20xf32, #tpu.memory_space<vmem>>, vector<1x20xf32>
      %16 = vector.broadcast %15 : vector<1x20xf32> to vector<104x20xf32>
      %17 = arith.addf %14, %16 : vector<104x20xf32>
      %c0_15 = arith.constant 0 : index
      %c0_16 = arith.constant 0 : index
      %c0_17 = arith.constant 0 : index
      %18 = vector.load %arg6[%c0_15, %c0_16, %c0_17] : memref<1x104x20xf32, #tpu.memory_space<vmem>>, vector<1x104x20xf32>
      %19 = vector.shape_cast %18 : vector<1x104x20xf32> to vector<104x20xf32>
      %20 = vector.shape_cast %17 : vector<104x20xf32> to vector<1x104x20xf32>
      tpu.vector_store %arg6[%c0_15, %c0_16, %c0_17], %20 {strides = array<i32>} : memref<1x104x20xf32, #tpu.memory_space<vmem>>, vector<1x104x20xf32>,
    } else {
    }
    return
  }
  func.func @transform_0(%arg0: i32, %arg1: i32, %arg2: i32) -> (i32, i32, i32) {
    %c2_i32 = arith.constant 2 : i32
    %0 = arith.muli %arg0, %c2_i32 : i32
    %1 = arith.addi %0, %arg2 : i32
    %c0_i32 = arith.constant 0 : i32
    %c0_i32_0 = arith.constant 0 : i32
    return %1, %arg1, %c0_i32 : i32, i32, i32
  }
  func.func @transform_1(%arg0: i32, %arg1: i32, %arg2: i32) -> (i32, i32, i32) {
    %c0_i32 = arith.constant 0 : i32
    %c0_i32_0 = arith.constant 0 : i32
    %c0_i32_1 = arith.constant 0 : i32
    return %arg2, %c0_i32, %c0_i32_0 : i32, i32, i32
  }
  func.func @transform_2(%arg0: i32, %arg1: i32, %arg2: i32) -> (i32, i32) {
    %c0_i32 = arith.constant 0 : i32
    %c0_i32_0 = arith.constant 0 : i32
    %c0_i32_1 = arith.constant 0 : i32
    return %c0_i32, %c0_i32_0 : i32, i32
  }
  func.func @transform_3(%arg0: i32, %arg1: i32, %arg2: i32) -> (i32, i32, i32) {
    %c0_i32 = arith.constant 0 : i32
    %c0_i32_0 = arith.constant 0 : i32
    return %arg0, %arg1, %c0_i32 : i32, i32, i32
  }
}

</mosaic_0001>

<bundles_post_ra>
// kernel: tpu_custom_call.1
= control target key start
LH: loop header
LB: loop body
LE: loop exit
PB: predicated region body
PF: predicated region fallthrough
CT: control target
= control target key end

     0   :  { %s859_s12 = smov 0   ;;  %s861_s13 = smov 0   ;;  %s1010_s0 = inlined_call_operand.vmem [shape: f32[8,100,20], index: 0, kind: input, shape index: {}]   ;;  %s1011_s1 = inlined_call_operand.vmem [shape: f32[2,20,20], index: 1, kind: input, shape index: {}]   ;;  %s1012_s2 = inlined_call_operand.vmem [shape: f32[1,20], index: 2, kind: input, shape index: {}]   ;;  %s1013_s3 = inlined_call_operand.vmem [shape: f32[4,100,20], index: 3, kind: output, shape index: {}]  }
   0x1   :  { %s863_s14 = smov 0   ;;  %s865_s15 = smov 0  }
   0x2   :  { %s867_s16 = smov 0  }
   0x3 LB: > { %s25_s17 = sadd.s32 1, %s826_s14  ;;  %s32_s18 = sadd.s32 1, %s830_s15  ;;  %s834_s16 = sphi %s867_s16, %s13_s16   ;;  %s830_s15 = sphi %s865_s15, %s1017_s15   ;;  %s826_s14 = sphi %s863_s14, %s1016_s14   ;;  %s822_s13 = sphi %s861_s13, %s1015_s13   ;;  %s818_s12 = sphi %s859_s12, %s1014_s12  }
   0x4   : > { %p26_p0 = scmp.ge.s32.totalorder %s25_s17, 2  ;;  %p659_p1 = scmp.ge.s32.totalorder %s834_s16, 1 }
   0x5   : > { %p183_p2 = scmp.lt.s32.totalorder %s834_s16, 9 }
   0x6   : > { %s1019_s17 = smov (%p26_p0, %s25_s17), 0  ;;  %s1021_s18 = smov (!%p26_p0, %s32_s18), %s830_s15 }
   0x7   : > { %p184_p3 = pnand %p659_p1, %p183_p2  ;;  %p34_p4 = scmp.ge.s32.totalorder %s1021_s18, 4 }
   0x8   : > { %s660_s19 = sshll.u32 (!%p184_p3), %s822_s13, 1  ;;  %p236_p5 = scmp.lt.s32.totalorder (!%p184_p3), %s818_s12, 1 }
   0x9   : > { %s1023_s18 = smov (%p34_p4, %s1021_s18), 0  ;;  %187 = sbr.rel (%p184_p3) target bundleno = 270 (0x10e), region = 32 }
   0xa   : > { %s223_s20 = sadd.s32 (!%p184_p3), %s818_s12, %s660_s19  ;;  %p242_p7 = scmp.lt.s32.totalorder (!%p184_p3), %s822_s13, 3 }
   0xb   : > { %p225_p6 = scmp.lt.s32.totalorder (!%p184_p3), %s223_s20, 7  ;;  %p664_p8 = scmp.ne.s32.totalorder (!%p184_p3), %s818_s12, 0 }
   0xe   : > { %s237_s21 = scalar_select %p236_p5, %s818_s12, 1 }
   0xf   : > { %s1025_s20 = smov (!%p225_p6, %s223_s20), 7  ;;  %s1027_s13 = smov (!%p242_p7, %s822_s13), 3 }
  0x10   : > { %s751_s22 = smul.u32 24, %s237_s21 }
  0x11   : > { %s750_s23 = smul.u32 104, %s1025_s20 }
  0x12   : > { %s897_s26 = scalar_lea.vmem %s1011_s1, %s751_s22  ;;  %s752_s30 = smul.u32 104, %s1027_s13 }
  0x13   : > { %s902_s29 = scalar_lea.vmem %s1010_s0, %s750_s23  ;;  %254 = sbr.rel (%p664_p8) target bundleno = 32 (0x20), region = 36 }
  0x14   : > { %s907_s6 = scalar_lea.vmem %s1013_s3, %s752_s30 }
  0x18   : > { %vm255_vm0 = vcmask 162816   ;;  %v836_v0 = vmov 0.0  }
  0x19   : > { %256 = vst.msk [vmem:[#allocation2] sm:$0xff] %vm255_vm0, %v836_v0  ;;  %257 = vst.msk [vmem:[#allocation2 + $0x8] sm:$0xff] %vm255_vm0, %v836_v0 }
  0x1a   : > { %258 = vst.msk [vmem:[#allocation2 + $0x10] sm:$0xff] %vm255_vm0, %v836_v0  ;;  %259 = vst.msk [vmem:[#allocation2 + $0x18] sm:$0xff] %vm255_vm0, %v836_v0 }
  0x1b   : > { %260 = vst.msk [vmem:[#allocation2 + $0x20] sm:$0xff] %vm255_vm0, %v836_v0  ;;  %261 = vst.msk [vmem:[#allocation2 + $0x28] sm:$0xff] %vm255_vm0, %v836_v0 }
  0x1c   : > { %262 = vst.msk [vmem:[#allocation2 + $0x30] sm:$0xff] %vm255_vm0, %v836_v0  ;;  %263 = vst.msk [vmem:[#allocation2 + $0x38] sm:$0xff] %vm255_vm0, %v836_v0 }
  0x1d   : > { %264 = vst.msk [vmem:[#allocation2 + $0x40] sm:$0xff] %vm255_vm0, %v836_v0  ;;  %265 = vst.msk [vmem:[#allocation2 + $0x48] sm:$0xff] %vm255_vm0, %v836_v0 }
  0x1e   : > { %266 = vst.msk [vmem:[#allocation2 + $0x50] sm:$0xff] %vm255_vm0, %v836_v0  ;;  %267 = vst.msk [vmem:[#allocation2 + $0x58] sm:$0xff] %vm255_vm0, %v836_v0 }
  0x1f   : > { %268 = vst.msk [vmem:[#allocation2 + $0x60] sm:$0xff] %vm255_vm0, %v836_v0 }
  0x20 PF: > { %v297_v1 = vld [vmem:[%s897_s26 + $0x10] sm:$0xf]  ;;  %vm338_vm1 = vcmask 1043456   ;;  %v837_v2 = vmov 0.0   ;;  %v296_v3 = vld [vmem:[%s897_s26 + $0x8] sm:$0xff]  ;;  %v295_v4 = vld [vmem:[%s897_s26] sm:$0xff] }
  0x21   : > { %699 = vmatprep.subr.mxu0 %v837_v2  ;;  %744 = vmatprep.subr.mxu1 %v837_v2  ;;  %v282_v5 = vld [vmem:[%s902_s29] sm:$0xff]  ;;  %vm298_vm2 = vcmask 162816   ;;  %vm838_vm3 = vmmov 0   ;;  %v289_v6 = vld [vmem:[%s902_s29 + $0x38] sm:$0xff]  ;;  %v283_v7 = vld [vmem:[%s902_s29 + $0x8] sm:$0xff]  ;;  %p679_p9 = scmp.ne.s32.totalorder %s818_s12, 1 }
  0x22   : > { %700 = vmatpush3.msk.msra.mxu0 %vm338_vm1, %v297_v1  ;;  %747 = vmatpush3.msk.msra.mxu1 %vm338_vm1, %v297_v1  ;;  %v290_v8 = vld [vmem:[%s902_s29 + $0x40] sm:$0xff]  ;;  %v284_v9 = vld [vmem:[%s902_s29 + $0x10] sm:$0xff]  ;;  %v291_v10 = vld [vmem:[%s902_s29 + $0x48] sm:$0xff] }
  0x23   : > { %701 = vmatprep.subr.mxu0 %v837_v2  ;;  %745 = vmatprep.subr.mxu1 %v837_v2  ;;  %v285_v11 = vld [vmem:[%s902_s29 + $0x18] sm:$0xff]  ;;  %v292_v12 = vld [vmem:[%s902_s29 + $0x50] sm:$0xff]  ;;  %v286_v13 = vld [vmem:[%s902_s29 + $0x20] sm:$0xff] }
  0x24   : > { %702 = vmatpush3.msra.mxu0 %v296_v3  ;;  %748 = vmatpush3.msra.mxu1 %v296_v3  ;;  %v293_v14 = vld [vmem:[%s902_s29 + $0x58] sm:$0xff]  ;;  %v287_v15 = vld [vmem:[%s902_s29 + $0x28] sm:$0xff]  ;;  %v294_v16 = vld [vmem:[%s902_s29 + $0x60] sm:$0xff] }
  0x25   : > { %703 = vmatprep.subr.mxu0 %v837_v2  ;;  %705 = vmatprep.mubr.msk.f32.mxu0 %vm838_vm3, %v837_v2  ;;  %v288_v17 = vld [vmem:[%s902_s29 + $0x30] sm:$0xff]  ;;  %v269_v18 = vld [vmem:[#allocation2] sm:$0xff]  ;;  %v276_v20 = vld [vmem:[#allocation2 + $0x38] sm:$0xff] }
  0x26   : > { %704 = vmatpush3.msra.mxu0 %v295_v4  ;;  %746 = vmatprep.subr.mxu1 %v837_v2  ;;  %v270_v24 = vld [vmem:[#allocation2 + $0x8] sm:$0xff]  ;;  %v277_v28 = vld [vmem:[#allocation2 + $0x40] sm:$0xff]  ;;  %v271_v32 = vld [vmem:[#allocation2 + $0x10] sm:$0xff] }
  0x27   : > { %706 = vmatmul.mubr.msk.f32.vlgmr.msra.gmra.mxu0 %vm298_vm2, %v282_v5  ;;  %749 = vmatpush3.msra.mxu1 %v295_v4  ;;  %v278_v36 = vld [vmem:[#allocation2 + $0x48] sm:$0xff]  ;;  %v272_v40 = vld [vmem:[#allocation2 + $0x18] sm:$0xff]  ;;  %v279_v44 = vld [vmem:[#allocation2 + $0x50] sm:$0xff] }
  0x28   : > { %726 = vmatprep.mubr.msk.f32.mxu1 %vm838_vm3, %v837_v2  ;;  %708 = vmatprep.mubr.msk.f32.mxu0 %vm838_vm3, %v837_v2  ;;  %v273_v48 = vld [vmem:[#allocation2 + $0x20] sm:$0xff]  ;;  %v280_v52 = vld [vmem:[#allocation2 + $0x58] sm:$0xff]  ;;  %v274_v56 = vld [vmem:[#allocation2 + $0x28] sm:$0xff] }
  0x29   : > { %727 = vmatmul.mubr.msk.f32.vlgmr.msra.gmra.mxu1 %vm298_vm2, %v289_v6  ;;  %v281_v60 = vld [vmem:[#allocation2 + $0x60] sm:$0xff]  ;;  %v275_v0 = vld [vmem:[#allocation2 + $0x30] sm:$0xff] }
  0x2a   : > { %729 = vmatprep.mubr.msk.f32.mxu1 %vm838_vm3, %v837_v2 }
  0x2b   : > { %709 = vmatmul.mubr.msk.f32.gmra.mxu0 %vm298_vm2, %v283_v7 }
  0x2c   : > { %711 = vmatprep.mubr.msk.f32.mxu0 %vm838_vm3, %v837_v2 }
  0x2d   : > { %730 = vmatmul.mubr.msk.f32.gmra.mxu1 %vm298_vm2, %v290_v8 }
  0x2e   : > { %732 = vmatprep.mubr.msk.f32.mxu1 %vm838_vm3, %v837_v2 }
  0x2f   : > { %712 = vmatmul.mubr.msk.f32.gmra.mxu0 %vm298_vm2, %v284_v9 }
  0x30   : > { %714 = vmatprep.mubr.msk.f32.mxu0 %vm838_vm3, %v837_v2 }
  0x31   : > { %733 = vmatmul.mubr.msk.f32.gmra.mxu1 %vm298_vm2, %v291_v10 }
  0x32   : > { %735 = vmatprep.mubr.msk.f32.mxu1 %vm838_vm3, %v837_v2 }
  0x33   : > { %715 = vmatmul.mubr.msk.f32.gmra.mxu0 %vm298_vm2, %v285_v11 }
  0x34   : > { %717 = vmatprep.mubr.msk.f32.mxu0 %vm838_vm3, %v837_v2 }
  0x35   : > { %736 = vmatmul.mubr.msk.f32.gmra.mxu1 %vm298_vm2, %v292_v12 }
  0x36   : > { %738 = vmatprep.mubr.msk.f32.mxu1 %vm838_vm3, %v837_v2 }
  0x37   : > { %718 = vmatmul.mubr.msk.f32.gmra.mxu0 %vm298_vm2, %v286_v13 }
  0x38   : > { %720 = vmatprep.mubr.msk.f32.mxu0 %vm838_vm3, %v837_v2 }
  0x39   : > { %739 = vmatmul.mubr.msk.f32.gmra.mxu1 %vm298_vm2, %v293_v14 }
  0x3a   : > { %741 = vmatprep.mubr.msk.f32.mxu1 %vm838_vm3, %v837_v2 }
  0x3b   : > { %721 = vmatmul.mubr.msk.f32.gmra.mxu0 %vm298_vm2, %v287_v15 }
  0x3c   : > { %723 = vmatprep.mubr.msk.f32.mxu0 %vm838_vm3, %v837_v2 }
  0x3d   : > { %742 = vmatmul.mubr.msk.f32.gmra.mxu1 %vm298_vm2, %v294_v16 }
  0x3f   : > { %724 = vmatmul.mubr.msk.f32.gmra.mxu0 %vm298_vm2, %v288_v17 }
  0xe7   : > { %v408_v19 = vpop.f32.mrf.mxu0 }
  0xe8   : > { %v472_v21 = vadd.f32 %v408_v19, %v269_v18 }
  0xe9   : > { %v707_v22 = vpop.f32.mrf.mxu0  ;;  %v443_v23 = vpop.f32.mrf.mxu1 }
  0xea   : > { %485 = vst.msk [vmem:[#allocation2] sm:$0xff] %vm298_vm2, %v472_v21  ;;  %v479_v25 = vadd.f32 %v443_v23, %v276_v20 }
  0xeb   : > { %v413_v26 = vpop.f32.mrf.mxu0  ;;  %v728_v27 = vpop.f32.mrf.mxu1 }
  0xec   : > { %492 = vst.msk [vmem:[#allocation2 + $0x38] sm:$0xff] %vm298_vm2, %v479_v25  ;;  %v473_v29 = vadd.f32 %v413_v26, %v270_v24 }
  0xed   : > { %v710_v30 = vpop.f32.mrf.mxu0  ;;  %v448_v31 = vpop.f32.mrf.mxu1 }
  0xee   : > { %486 = vst.msk [vmem:[#allocation2 + $0x8] sm:$0xff] %vm298_vm2, %v473_v29  ;;  %v480_v33 = vadd.f32 %v448_v31, %v277_v28 }
  0xef   : > { %v418_v34 = vpop.f32.mrf.mxu0  ;;  %v731_v35 = vpop.f32.mrf.mxu1 }
  0xf0   : > { %493 = vst.msk [vmem:[#allocation2 + $0x40] sm:$0xff] %vm298_vm2, %v480_v33  ;;  %v474_v37 = vadd.f32 %v418_v34, %v271_v32 }
  0xf1   : > { %v713_v38 = vpop.f32.mrf.mxu0  ;;  %v453_v39 = vpop.f32.mrf.mxu1 }
  0xf2   : > { %487 = vst.msk [vmem:[#allocation2 + $0x10] sm:$0xff] %vm298_vm2, %v474_v37  ;;  %v481_v41 = vadd.f32 %v453_v39, %v278_v36 }
  0xf3   : > { %v423_v42 = vpop.f32.mrf.mxu0  ;;  %v734_v43 = vpop.f32.mrf.mxu1 }
  0xf4   : > { %494 = vst.msk [vmem:[#allocation2 + $0x48] sm:$0xff] %vm298_vm2, %v481_v41  ;;  %v475_v45 = vadd.f32 %v423_v42, %v272_v40 }
  0xf5   : > { %v716_v46 = vpop.f32.mrf.mxu0  ;;  %v458_v47 = vpop.f32.mrf.mxu1 }
  0xf6   : > { %488 = vst.msk [vmem:[#allocation2 + $0x18] sm:$0xff] %vm298_vm2, %v475_v45  ;;  %v482_v49 = vadd.f32 %v458_v47, %v279_v44 }
  0xf7   : > { %v428_v50 = vpop.f32.mrf.mxu0  ;;  %v737_v51 = vpop.f32.mrf.mxu1 }
  0xf8   : > { %495 = vst.msk [vmem:[#allocation2 + $0x50] sm:$0xff] %vm298_vm2, %v482_v49  ;;  %v476_v53 = vadd.f32 %v428_v50, %v273_v48 }
  0xf9   : > { %v719_v54 = vpop.f32.mrf.mxu0  ;;  %v463_v55 = vpop.f32.mrf.mxu1 }
  0xfa   : > { %489 = vst.msk [vmem:[#allocation2 + $0x20] sm:$0xff] %vm298_vm2, %v476_v53  ;;  %v483_v57 = vadd.f32 %v463_v55, %v280_v52 }
  0xfb   : > { %v433_v58 = vpop.f32.mrf.mxu0  ;;  %v740_v59 = vpop.f32.mrf.mxu1 }
  0xfc   : > { %496 = vst.msk [vmem:[#allocation2 + $0x58] sm:$0xff] %vm298_vm2, %v483_v57  ;;  %v477_v61 = vadd.f32 %v433_v58, %v274_v56 }
  0xfd   : > { %v722_v62 = vpop.f32.mrf.mxu0  ;;  %v468_v63 = vpop.f32.mrf.mxu1 }
  0xfe   : > { %490 = vst.msk [vmem:[#allocation2 + $0x28] sm:$0xff] %vm298_vm2, %v477_v61  ;;  %v484_v1 = vadd.f32 %v468_v63, %v281_v60  ;;  %501 = sbr.rel (%p679_p9) target bundleno = 270 (0x10e), region = 40 }
  0xff   : > { %v438_v2 = vpop.f32.mrf.mxu0  ;;  %v743_v3 = vpop.f32.mrf.mxu1 }
 0x100   : > { %497 = vst.msk [vmem:[#allocation2 + $0x60] sm:$0xff] %vm298_vm2, %v484_v1  ;;  %v478_v4 = vadd.f32 %v438_v2, %v275_v0 }
 0x101   : > { %v725_v5 = vpop.f32.mrf.mxu0 }
 0x102   : > { %491 = vst.msk [vmem:[#allocation2 + $0x30] sm:$0xff] %vm298_vm2, %v478_v4 }
 0x103   : > { %v502_v6 = vld [vmem:[#allocation2] sm:$0xff]  ;;  %v503_v8 = vld [vmem:[#allocation2 + $0x8] sm:$0xff]  ;;  %v504_v11 = vld [vmem:[#allocation2 + $0x10] sm:$0xff] }
 0x104   : > { %v680_v7 = vld [vmem:[%s1012_s2] ss:$0 sm:$0xff]  ;;  %v505_v12 = vld [vmem:[#allocation2 + $0x18] sm:$0xff]  ;;  %v511_v24 = vld [vmem:[#allocation2 + $0x48] sm:$0xff] }
 0x105   : > { %v522_v9 = vadd.f32 %v680_v7, %v502_v6  ;;  %v523_v10 = vadd.f32 %v680_v7, %v503_v8  ;;  %v506_v13 = vld [vmem:[#allocation2 + $0x20] sm:$0xff]  ;;  %v524_v14 = vadd.f32 %v680_v7, %v504_v11  ;;  %v525_v15 = vadd.f32 %v680_v7, %v505_v12  ;;  %v507_v17 = vld [vmem:[#allocation2 + $0x28] sm:$0xff]  ;;  %v509_v19 = vld [vmem:[#allocation2 + $0x38] sm:$0xff] }
 0x106   : > { %v526_v16 = vadd.f32 %v680_v7, %v506_v13  ;;  %v527_v20 = vadd.f32 %v680_v7, %v507_v17  ;;  %v529_v22 = vadd.f32 %v680_v7, %v509_v19  ;;  %v510_v23 = vld [vmem:[#allocation2 + $0x40] sm:$0xff]  ;;  %v512_v25 = vld [vmem:[#allocation2 + $0x50] sm:$0xff]  ;;  %v531_v27 = vadd.f32 %v680_v7, %v511_v24  ;;  %v513_v29 = vld [vmem:[#allocation2 + $0x58] sm:$0xff] }
 0x107   : > { %535 = vst.msk [vmem:[%s907_s6] sm:$0xff] %vm298_vm2, %v522_v9  ;;  %536 = vst.msk [vmem:[%s907_s6 + $0x8] sm:$0xff] %vm298_vm2, %v523_v10  ;;  %v530_v26 = vadd.f32 %v680_v7, %v510_v23  ;;  %v532_v28 = vadd.f32 %v680_v7, %v512_v25  ;;  %v514_v30 = vld [vmem:[#allocation2 + $0x60] sm:$0xff]  ;;  %v533_v31 = vadd.f32 %v680_v7, %v513_v29 }
 0x108   : > { %537 = vst.msk [vmem:[%s907_s6 + $0x10] sm:$0xff] %vm298_vm2, %v524_v14  ;;  %538 = vst.msk [vmem:[%s907_s6 + $0x18] sm:$0xff] %vm298_vm2, %v525_v15  ;;  %v534_v32 = vadd.f32 %v680_v7, %v514_v30 }
 0x109   : > { %v508_v18 = vld [vmem:[#allocation2 + $0x30] sm:$0xff]  ;;  %539 = vst.msk [vmem:[%s907_s6 + $0x20] sm:$0xff] %vm298_vm2, %v526_v16  ;;  %540 = vst.msk [vmem:[%s907_s6 + $0x28] sm:$0xff] %vm298_vm2, %v527_v20 }
 0x10a   : > { %v528_v21 = vadd.f32 %v680_v7, %v508_v18  ;;  %542 = vst.msk [vmem:[%s907_s6 + $0x38] sm:$0xff] %vm298_vm2, %v529_v22  ;;  %543 = vst.msk [vmem:[%s907_s6 + $0x40] sm:$0xff] %vm298_vm2, %v530_v26 }
 0x10b   : > { %544 = vst.msk [vmem:[%s907_s6 + $0x48] sm:$0xff] %vm298_vm2, %v531_v27  ;;  %545 = vst.msk [vmem:[%s907_s6 + $0x50] sm:$0xff] %vm298_vm2, %v532_v28 }
 0x10c   : > { %541 = vst.msk [vmem:[%s907_s6 + $0x30] sm:$0xff] %vm298_vm2, %v528_v21  ;;  %546 = vst.msk [vmem:[%s907_s6 + $0x58] sm:$0xff] %vm298_vm2, %v533_v31 }
 0x10d   : > { %547 = vst.msk [vmem:[%s907_s6 + $0x60] sm:$0xff] %vm298_vm2, %v534_v32 }
 0x10e PF: > { %s13_s16 = sadd.s32 1, %s834_s16   ;;  %s1014_s12 = smov %s826_s14 }
 0x10f   : > { %p10_p10 = scmp.ge.s32.totalorder %s13_s16, 10   ;;  %s1015_s13 = smov %s830_s15 }
 0x110   : > { %s1016_s14 = smov %s1019_s17  ;;  %s1017_s15 = smov %s1023_s18 }
 0x111   :  { %12 = sbr.rel (!%p10_p10) target bundleno = 3 (0x3), region = 73 }

</bundles_post_ra>
